<compile_context>
chip_gen: v5e
topology: v5e:2x2
jax: 0.10.0
libtpu: 0.0.40
codegen_flags: <defaults>
</compile_context>

<pallas_src>
import jax
import jax.numpy as jnp
from jax.experimental import pallas as pl
from jax.experimental.pallas import tpu as pltpu


def _spatial_descriptor_kernel(x_ref, w1_ref, b1_ref, w2_ref, b2_ref, o_ref):
    # x_ref:  (3, TN)   f32   input points, NCW (channels on sublanes)
    # w1_ref: (64, 3)   f32   conv1 weight (BN1 folded)
    # b1_ref: (64, 1)   f32   conv1 bias   (BN1 folded)
    # w2_ref: (64, 64)  bf16  conv2 weight (BN2 folded)
    # b2_ref: (64, 1)   f32   conv2 bias   (BN2 folded)
    # o_ref:  (64, TN)  f32   output block
    x = x_ref[...]                                                  # (3, TN)

    # Layer 1: (64,3) @ (3,TN) -> (64,TN). K=3 is MXU-padding-dominated but
    # the FLOPs are negligible; the kernel is bound by the output writeback.
    h = jnp.dot(w1_ref[...], x, preferred_element_type=jnp.float32)
    h = jnp.maximum(h + b1_ref[...], 0.0)                           # f32 VPU

    # Layer 2: bf16 operands into the MXU, f32 accumulation.
    h2 = jnp.dot(w2_ref[...], h.astype(jnp.bfloat16),
                 preferred_element_type=jnp.float32)                # (64, TN)
    h2 = jnp.maximum(h2 + b2_ref[...], 0.0)                         # f32 VPU

    o_ref[...] = h2.astype(o_ref.dtype)


def spatial_descriptor(centers, params, *, tn=2048):
    """centers: (B, 3, N) float32 (PyTorch NCW). Returns (B, 64, N) float32."""
    B, C_in, N = centers.shape
    assert C_in == 3

    # ---- fold BatchNorm (eval / running stats) into the 1x1 convs -----------
    eps = 1e-5
    w1 = params["conv1_w"][:, :, 0]          # (64, 3)
    b1 = params["conv1_b"]                   # (64,)
    w2 = params["conv2_w"][:, :, 0]          # (64, 64)
    b2 = params["conv2_b"]                   # (64,)

    s1 = params["bn1_gamma"] / jnp.sqrt(params["bn1_var"] + eps)
    t1 = params["bn1_beta"] - params["bn1_mean"] * s1
    s2 = params["bn2_gamma"] / jnp.sqrt(params["bn2_var"] + eps)
    t2 = params["bn2_beta"] - params["bn2_mean"] * s2

    w1f = (w1 * s1[:, None]).astype(jnp.float32)           # (64, 3)  f32
    b1f = ((b1 * s1 + t1)[:, None]).astype(jnp.float32)    # (64, 1)  f32
    w2f = (w2 * s2[:, None]).astype(jnp.bfloat16)          # (64, 64) bf16 (MXU)
    b2f = ((b2 * s2 + t2)[:, None]).astype(jnp.float32)    # (64, 1)  f32

    x = centers.astype(jnp.float32)                        # NCW kept, no transpose

    # ---- tile the point dimension -------------------------------------------
    TN = min(tn, N)
    if TN < N:
        # Block that does not cover the full axis must have a lane dim that is
        # a multiple of 128; a ragged last tile is handled by Pallas masking
        # (per-point op, so garbage in the padded region never leaks).
        TN = max(128, (TN // 128) * 128)
    nt = pl.cdiv(N, TN)

    out = pl.pallas_call(
        _spatial_descriptor_kernel,
        out_shape=jax.ShapeDtypeStruct((B, 64, N), jnp.float32),
        grid_spec=pltpu.PrefetchScalarGridSpec(
            num_scalar_prefetch=0,
            grid=(B, nt),
            in_specs=[
                pl.BlockSpec((None, 3, TN), lambda b, n: (b, 0, n)),   # points
                pl.BlockSpec((64, 3), lambda b, n: (0, 0)),            # w1 (resident)
                pl.BlockSpec((64, 1), lambda b, n: (0, 0)),            # b1
                pl.BlockSpec((64, 64), lambda b, n: (0, 0)),           # w2
                pl.BlockSpec((64, 1), lambda b, n: (0, 0)),            # b2
            ],
            out_specs=pl.BlockSpec((None, 64, TN), lambda b, n: (b, 0, n)),
        ),
        compiler_params=pltpu.CompilerParams(
            dimension_semantics=("parallel", "parallel")),
    )(x, w1f, b1f, w2f, b2f)

    return out                                             # (B, 64, N), NCW


def init_params(key):
    """Deterministic synthetic parameters matching the PyTorch module shapes."""
    ks = jax.random.split(key, 8)
    params = {
        "conv1_w": jax.random.normal(ks[0], (64, 3, 1), jnp.float32) * 0.1,
        "conv1_b": jax.random.normal(ks[1], (64,), jnp.float32) * 0.1,
        "conv2_w": jax.random.normal(ks[2], (64, 64, 1), jnp.float32) * 0.1,
        "conv2_b": jax.random.normal(ks[3], (64,), jnp.float32) * 0.1,
        "bn1_gamma": jnp.ones((64,), jnp.float32) + 0.05 * jax.random.normal(ks[4], (64,)),
        "bn1_beta": 0.05 * jax.random.normal(ks[5], (64,)),
        "bn1_mean": jnp.zeros((64,), jnp.float32),
        "bn1_var": jnp.ones((64,), jnp.float32),
        "bn2_gamma": jnp.ones((64,), jnp.float32) + 0.05 * jax.random.normal(ks[6], (64,)),
        "bn2_beta": 0.05 * jax.random.normal(ks[7], (64,)),
        "bn2_mean": jnp.zeros((64,), jnp.float32),
        "bn2_var": jnp.ones((64,), jnp.float32),
    }
    # TODO(synk): BatchNorm is implemented in eval mode (running stats); PyTorch
    # training-mode batch statistics are not reproduced here.
    return params


def _reference(centers, params):
    """Pure-JAX f32 reference for correctness checking."""
    eps = 1e-5
    x = centers
    w1 = params["conv1_w"][:, :, 0]
    h = jnp.einsum("oc,bcn->bon", w1, x) + params["conv1_b"][None, :, None]
    h = (h - params["bn1_mean"][None, :, None]) / jnp.sqrt(params["bn1_var"] + eps)[None, :, None]
    h = h * params["bn1_gamma"][None, :, None] + params["bn1_beta"][None, :, None]
    h = jnp.maximum(h, 0.0)
    w2 = params["conv2_w"][:, :, 0]
    h = jnp.einsum("oc,bcn->bon", w2, h) + params["conv2_b"][None, :, None]
    h = (h - params["bn2_mean"][None, :, None]) / jnp.sqrt(params["bn2_var"] + eps)[None, :, None]
    h = h * params["bn2_gamma"][None, :, None] + params["bn2_beta"][None, :, None]
    return jnp.maximum(h, 0.0)


if __name__ == "__main__":
    key = jax.random.PRNGKey(0)
    k_in, k_par = jax.random.split(key)

    B, N = 2, 1024   # small: 2 meshes, 1024 face centers, 3 coords
    centers = jax.random.normal(k_in, (B, 3, N), jnp.float32)
    params = init_params(k_par)

    # tn=256 exercises the multi-tile grid path: grid = (2, 4)
    out = spatial_descriptor(centers, params, tn=256)
    out = jax.block_until_ready(out)

    ref = _reference(centers, params)
    assert out.shape == (B, 64, N), out.shape
    # bf16 MXU operands on layer 2 -> loosen the f32 tolerance.
    assert jnp.allclose(out, ref, atol=2e-2, rtol=2e-2), \
        float(jnp.max(jnp.abs(out - ref)))

    print("KERNEL_OK")
</pallas_src>

<mosaic_0001>
module attributes {stable_mosaic.version = 11 : i64} {
  func.func @_spatial_descriptor_kernel(%arg0: i32, %arg1: i32, %arg2: memref<1x3x256xf32, #tpu.memory_space<vmem>>, %arg3: memref<64x3xf32, #tpu.memory_space<vmem>>, %arg4: memref<64x1xf32, #tpu.memory_space<vmem>>, %arg5: memref<64x64xbf16, #tpu.memory_space<vmem>>, %arg6: memref<64x1xf32, #tpu.memory_space<vmem>>, %arg7: memref<1x64x256xf32, #tpu.memory_space<vmem>>) attributes {dimension_semantics = [#tpu.dimension_semantics<parallel>, #tpu.dimension_semantics<parallel>], iteration_bounds = array<i64: 2, 4>, scalar_prefetch = 0 : i64, scratch_operands = 0 : i64, tpu.core_type = #tpu.core_type<tc>, window_params = [{transform_indices = @transform_0, window_bounds = array<i64: 1, 3, 256>}, {pipeline_mode = #tpu.pipeline_mode<synchronous>, transform_indices = @transform_1, window_bounds = array<i64: 64, 3>}, {pipeline_mode = #tpu.pipeline_mode<synchronous>, transform_indices = @transform_2, window_bounds = array<i64: 64, 1>}, {pipeline_mode = #tpu.pipeline_mode<synchronous>, transform_indices = @transform_3, window_bounds = array<i64: 64, 64>}, {pipeline_mode = #tpu.pipeline_mode<synchronous>, transform_indices = @transform_4, window_bounds = array<i64: 64, 1>}, {transform_indices = @transform_5, window_bounds = array<i64: 1, 64, 256>}]} {
    %c0 = arith.constant 0 : index
    %c0_0 = arith.constant 0 : index
    %c0_1 = arith.constant 0 : index
    %0 = vector.load %arg2[%c0, %c0_0, %c0_1] : memref<1x3x256xf32, #tpu.memory_space<vmem>>, vector<1x3x256xf32>
    %1 = vector.shape_cast %0 : vector<1x3x256xf32> to vector<3x256xf32>
    %c0_2 = arith.constant 0 : index
    %c0_3 = arith.constant 0 : index
    %2 = vector.load %arg3[%c0_2, %c0_3] : memref<64x3xf32, #tpu.memory_space<vmem>>, vector<64x3xf32>
    %cst = arith.constant dense<0.000000e+00> : vector<64x256xf32>
    %3 = tpu.matmul %2, %1, %cst {dimension_numbers = #tpu.dot_dimension_numbers<[1], [0], [0], [1], [0, 0, 1, 1], [], []>} : vector<64x3xf32>, vector<3x256xf32>, vector<64x256xf32> -> vector<64x256xf32>
    %c0_4 = arith.constant 0 : index
    %c0_5 = arith.constant 0 : index
    %4 = vector.load %arg4[%c0_4, %c0_5] : memref<64x1xf32, #tpu.memory_space<vmem>>, vector<64x1xf32>
    %5 = vector.broadcast %4 : vector<64x1xf32> to vector<64x256xf32>
    %6 = arith.addf %3, %5 : vector<64x256xf32>
    %cst_6 = arith.constant 0.000000e+00 : f32
    %7 = vector.broadcast %cst_6 : f32 to vector<64x256xf32>
    %8 = arith.maximumf %6, %7 : vector<64x256xf32>
    %c0_7 = arith.constant 0 : index
    %c0_8 = arith.constant 0 : index
    %9 = vector.load %arg5[%c0_7, %c0_8] : memref<64x64xbf16, #tpu.memory_space<vmem>>, vector<64x64xbf16>
    %10 = arith.truncf %8 : vector<64x256xf32> to vector<64x256xbf16>
    %cst_9 = arith.constant dense<0.000000e+00> : vector<64x256xf32>
    %11 = tpu.matmul %9, %10, %cst_9 {dimension_numbers = #tpu.dot_dimension_numbers<[1], [0], [0], [1], [0, 0, 1, 1], [], []>} : vector<64x64xbf16>, vector<64x256xbf16>, vector<64x256xf32> -> vector<64x256xf32>
    %c0_10 = arith.constant 0 : index
    %c0_11 = arith.constant 0 : index
    %12 = vector.load %arg6[%c0_10, %c0_11] : memref<64x1xf32, #tpu.memory_space<vmem>>, vector<64x1xf32>
    %13 = vector.broadcast %12 : vector<64x1xf32> to vector<64x256xf32>
    %14 = arith.addf %11, %13 : vector<64x256xf32>
    %cst_12 = arith.constant 0.000000e+00 : f32
    %15 = vector.broadcast %cst_12 : f32 to vector<64x256xf32>
    %16 = arith.maximumf %14, %15 : vector<64x256xf32>
    %c0_13 = arith.constant 0 : index
    %c0_14 = arith.constant 0 : index
    %c0_15 = arith.constant 0 : index
    %17 = vector.load %arg7[%c0_13, %c0_14, %c0_15] : memref<1x64x256xf32, #tpu.memory_space<vmem>>, vector<1x64x256xf32>
    %18 = vector.shape_cast %17 : vector<1x64x256xf32> to vector<64x256xf32>
    %19 = vector.shape_cast %16 : vector<64x256xf32> to vector<1x64x256xf32>
    tpu.vector_store %arg7[%c0_13, %c0_14, %c0_15], %19 {strides = array<i32>} : memref<1x64x256xf32, #tpu.memory_space<vmem>>, vector<1x64x256xf32>,
    return
  }
  func.func @transform_0(%arg0: i32, %arg1: i32) -> (i32, i32, i32) {
    %c0_i32 = arith.constant 0 : i32
    %c0_i32_0 = arith.constant 0 : i32
    return %arg0, %c0_i32, %arg1 : i32, i32, i32
  }
  func.func @transform_1(%arg0: i32, %arg1: i32) -> (i32, i32) {
    %c0_i32 = arith.constant 0 : i32
    %c0_i32_0 = arith.constant 0 : i32
    %c0_i32_1 = arith.constant 0 : i32
    return %c0_i32, %c0_i32_0 : i32, i32
  }
  func.func @transform_2(%arg0: i32, %arg1: i32) -> (i32, i32) {
    %c0_i32 = arith.constant 0 : i32
    %c0_i32_0 = arith.constant 0 : i32
    %c0_i32_1 = arith.constant 0 : i32
    return %c0_i32, %c0_i32_0 : i32, i32
  }
  func.func @transform_3(%arg0: i32, %arg1: i32) -> (i32, i32) {
    %c0_i32 = arith.constant 0 : i32
    %c0_i32_0 = arith.constant 0 : i32
    %c0_i32_1 = arith.constant 0 : i32
    return %c0_i32, %c0_i32_0 : i32, i32
  }
  func.func @transform_4(%arg0: i32, %arg1: i32) -> (i32, i32) {
    %c0_i32 = arith.constant 0 : i32
    %c0_i32_0 = arith.constant 0 : i32
    %c0_i32_1 = arith.constant 0 : i32
    return %c0_i32, %c0_i32_0 : i32, i32
  }
  func.func @transform_5(%arg0: i32, %arg1: i32) -> (i32, i32, i32) {
    %c0_i32 = arith.constant 0 : i32
    %c0_i32_0 = arith.constant 0 : i32
    return %arg0, %c0_i32, %arg1 : i32, i32, i32
  }
}

</mosaic_0001>

<bundles_post_ra>
// kernel: tpu_custom_call.1
= control target key start
LH: loop header
LB: loop body
LE: loop exit
PB: predicated region body
PF: predicated region fallthrough
CT: control target
= control target key end

     0   :  { %10 = vsyncpa [#allocation3], 0  ;;  %s1248_s0 = inlined_call_operand.vmem [shape: f32[2,3,1024], index: 0, kind: input, shape index: {}]   ;;  %s1249_s1 = inlined_call_operand.vmem [shape: f32[64,3], index: 1, kind: input, shape index: {}]   ;;  %s1250_s2 = inlined_call_operand.vmem [shape: f32[64,1], index: 2, kind: input, shape index: {}]   ;;  %s1251_s3 = inlined_call_operand.vmem [shape: bf16[64,64], index: 3, kind: input, shape index: {}]   ;;  %s1252_s4 = inlined_call_operand.vmem [shape: f32[64,1], index: 4, kind: input, shape index: {}]   ;;  %s1253_s5 = inlined_call_operand.hbm [shape: f32[2,64,1024], index: 5, kind: output, shape index: {}]  }
   0x1   :  { %12 = vsyncpa [#allocation3 + $0x1], 0  ;;  %s1000_s18 = smov 0   ;;  %s1002_s19 = smov 0  }
   0x2   :  { %s1004_s20 = smov 0   ;;  %s1006_s21 = smov 0  }
   0x3   :  { %s1008_s22 = smov 0   ;;  %s1010_s23 = smov 0  }
   0x4   :  { %s1012_s24 = smov 0   ;;  %s1014_s25 = smov 0  }
   0x5 LB: > { %s731_s26 = sadd.s32 4294967295, %s964_s25   ;;  %s732_s27 = sadd.s32 4294967294, %s964_s25   ;;  %s964_s25 = sphi %s1014_s25, %s18_s25   ;;  %s960_s24 = sphi %s1012_s24, %s1268_s24   ;;  %s956_s23 = sphi %s1010_s23, %s1267_s23   ;;  %s952_s22 = sphi %s1008_s22, %s1266_s22   ;;  %s948_s21 = sphi %s1006_s21, %s1265_s21   ;;  %s944_s20 = sphi %s1004_s20, %s1264_s20   ;;  %s940_s19 = sphi %s1002_s19, %s1263_s19   ;;  %s936_s18 = sphi %s1000_s18, %s1262_s18  }
   0x6   : > { %s27_s28 = sadd.s32 1, %s956_s23  ;;  %s30_s29 = sadd.s32 1, %s960_s24 }
   0x7   : > { %p28_p0 = scmp.ge.s32.totalorder %s27_s28, 4  ;;  %p161_p1 = scmp.ne.s32.totalorder %s944_s20, %s940_s19 }
   0x8   : > { %p162_p2 = scmp.eq.s32.totalorder %s731_s26, 7  ;;  %p167_p5 = scmp.ne.s32.totalorder %s940_s19, %s936_s18 }
   0x9   : > { %s1270_s28 = smov (%p28_p0, %s27_s28), 0  ;;  %s1272_s29 = smov (!%p28_p0, %s30_s29), %s960_s24 }
   0xa   : > { %1256 = sst [smem:[#allocation5_spill]] %s1270_s28  ;;  %s147_s30 = ssub.s32 %s956_s23, %s1270_s28 }
   0xb   : > { %p1051_p3 = por %p162_p2, %p161_p1  ;;  %p32_p4 = scmp.ge.s32.totalorder %s1272_s29, 2 }
   0xc   : > { %p168_p6 = scmp.eq.s32.totalorder %s732_s27, 7  ;;  %p735_p7 = scmp.ge.s32.totalorder %s964_s25, 1 }
   0xd   : > { %s1274_s29 = smov (%p32_p4, %s1272_s29), 0  ;;  %p211_p9 = scmp.lt.s32.totalorder %s964_s25, 9 }
   0xe   : > { %1258 = sst [smem:[#allocation6_spill]] %s1274_s29  ;;  %p1060_p8 = por %p168_p6, %p167_p5 }
   0xf   : > { %s146_s8 = ssub.s32 %s960_s24, %s1274_s29  ;;  %s151_s9 = sadd.s32 1, %s944_s20 }
  0x10   : > { %s148_s10 = sor.u32 %s147_s30, %s146_s8  ;;  %p212_p10 = pnand %p735_p7, %p211_p9 }
  0x11   : > { %p149_p11 = scmp.eq.s32.totalorder %s148_s10, 0  ;;  %s1075_s14 = sshll.u32 (!%p212_p10), %s948_s21, 1 }
  0x12   : > { %215 = sbr.rel (%p212_p10) target bundleno = 440 (0x1b8), region = 40  ;;  %p244_p12 = scmp.lt.s32.totalorder (!%p212_p10), %s952_s22, 1 }
  0x13   : > { %s1069_s11 = scalar_select %p149_p11, %s944_s20, %s151_s9  }
  0x14   : > { %p246_p13 = scmp.lt.s32.totalorder (!%p212_p10), %s1075_s14, 7  ;;  %s240_s28 = sand.u32 (!%p212_p10), 1, %s940_s19  }
  0x15   : > { %s736_s29 = sshll.u32 (!%p212_p10), %s240_s28, 7  ;;  %s784_s8 = sshll.u32 (!%p212_p10), %s952_s22, 6 }
  0x16   : > { %s643_s9 = sadd.s32 (!%p212_p10), %s784_s8, %s1075_s14  ;;  %s632_s16 = scalar_lea.sflag (!%p212_p10), [#allocation3], %s240_s28 }
  0x17   : > { %v270_v0 = vld [vmem:[%s1250_s2 + $0x30] sm:$0xff]  ;;  %v966_v1 = vmov 0   ;;  %v268_v2 = vld [vmem:[%s1250_s2 + $0x20] sm:$0xff]  ;;  %s245_s17 = scalar_select %p244_p12, %s952_s22, 1  ;;  %v271_v3 = vld [vmem:[%s1250_s2 + $0x38] sm:$0xff]  ;;  %vm341_vm0 = vcmask 1042432  }
  0x18   : > { %867 = vset.pattern.permute.xlu0 %v966_v1  ;;  %868 = vset.pattern.permute.xlu1 %v966_v1  ;;  %s247_s26 = scalar_select %p246_p13, %s1075_s14, 7  ;;  %v269_v4 = vld [vmem:[%s1250_s2 + $0x28] sm:$0xff]  ;;  %v256_v6 = vld [vmem:[%s1249_s1] sm:$0xff]  ;;  %vm316_vm1 = vcmask 23552   ;;  %v258_v13 = vld [vmem:[%s1249_s1 + $0x10] sm:$0xff]  ;;  %vm528_vm2 = vcmask 523264  }
  0x19   : > { %304 = vperm.xlu0 %867, %v270_v0   ;;  %294 = vperm.xlu1 %868, %v268_v2   ;;  %s738_s27 = sshll.u32 %s245_s17, 3  ;;  %v264_v7 = vld [vmem:[%s1250_s2] sm:$0xff]  ;;  %v265_v8 = vld [vmem:[%s1250_s2 + $0x8] sm:$0xff]  ;;  %v266_v14 = vld [vmem:[%s1250_s2 + $0x10] sm:$0xff] }
  0x1a   : > { %869 = vset.pattern.permute.xlu2 %v966_v1  ;;  %s249_s30 = sadd.s32 %s738_s27, %s247_s26  ;;  %v257_v11 = vld [vmem:[%s1249_s1 + $0x8] sm:$0xff]  ;;  %v464_v15 = vld [vmem:[%s1252_s4 + $0x20] sm:$0xff]  ;;  %v462_v16 = vld [vmem:[%s1252_s4 + $0x10] sm:$0xff] }
  0x1b   : > { %s739_s21 = sshll.u32 %s249_s30, 2  ;;  %v461_v12 = vld [vmem:[%s1252_s4 + $0x8] sm:$0xff]  ;;  %284 = vperm.xlu2 %869, %v266_v14   ;;  %v259_v17 = vld [vmem:[%s1249_s1 + $0x18] sm:$0xff]  ;;  %v260_v21 = vld [vmem:[%s1249_s1 + $0x20] sm:$0xff] }
  0x1c   : > { %s251_s10 = scalar_lea.vmem %s1248_s0, %s739_s21  ;;  %v267_v18 = vld [vmem:[%s1250_s2 + $0x18] sm:$0xff]  ;;  %v465_v20 = vld [vmem:[%s1252_s4 + $0x28] sm:$0xff]  ;;  %v460_v22 = vld [vmem:[%s1252_s4] sm:$0xff]  ;;  %s1184_s21 = scalar_lea.vmem [#allocation2], %s736_s29 }
  0x1d   : > { %v255_v5 = vld [vmem:[%s251_s10] sm:$0x77]  ;;  %v467_v19 = vld [vmem:[%s1252_s4 + $0x38] sm:$0xff]  ;;  %v261_v23 = vld [vmem:[%s1249_s1 + $0x28] sm:$0xff]  ;;  %s785_s10 = sshll.u32 %s643_s9, 3  ;;  %s646_s15 = sshll.u32 %s1184_s21, 4  ;;  %s647_s15 = int_to_ptr.vmem [resolvable:$true] %s646_s15 }
  0x1e   : > { %313 = vst [vmem:[#allocation1] ss:$2 sm:$0xff] %v255_v5  ;;  %v463_v24 = vld [vmem:[%s1252_s4 + $0x18] sm:$0xff]  ;;  %v262_v25 = vld [vmem:[%s1249_s1 + $0x30] sm:$0xff]  ;;  %s645_s22 = scalar_lea.hbm %s1253_s5, %s785_s10  ;;  %s890_s29 = scalar_lea.hbm %s1253_s5, 1024 }
  0x1f   : > { %v466_v26 = vld [vmem:[%s1252_s4 + $0x30] sm:$0xff]  ;;  %v263_v27 = vld [vmem:[%s1249_s1 + $0x38] sm:$0xff]  ;;  %s648_s14 = sshll.u32 %s645_s22, 4  ;;  %s649_s14 = int_to_ptr.hbm [resolvable:$true] %s648_s14 }
  0x20   : > { %s884_s17 = sshra.s32 %s649_s14, 4  ;;  %s885_s17 = int_to_ptr.hbm [resolvable:$true] %s884_s17 }
  0x21   : > { %309 = vperm.xlu0 %867, %v271_v3   ;;  %299 = vperm.xlu1 %868, %v269_v4   ;;  %s886_s26 = scalar_lea.hbm %s885_s17, 128  ;;  %p891_p4 = scmp.lt.s32.totalorder %s885_s17, %s1253_s5 }
  0x22   : > { %p887_p0 = scmp.ne.s32.totalorder %s885_s17, %s886_s26  ;;  %p892_p5 = scmp.lt.s32.totalorder %s890_s29, %s886_s26 }
  0x23   : > { %289 = vperm.xlu2 %869, %v267_v18  }
  0x24   : > { %p888_p1 = pnand %p887_p0, %p1051_p3  ;;  %p893_p6 = por %p892_p5, %p891_p4 }
  0x25   : > { %v314_v9 = vld.sshfl [vmem:[#allocation1] sm:$0xff pattern:$0x75316420]  ;;  %v315_v10 = vld.sshfl [vmem:[#allocation1 + $0x8] sm:$0xff pattern:$0x75316420] }
  0x26   : > { %740 = vmatpush.msk.msra.mxu0 %vm341_vm0, %v314_v9  ;;  %749 = vmatpush.msk.msra.mxu1 %vm341_vm0, %v315_v10  ;;  %p889_p2 = pneg %p888_p1 }
  0x27   : > { %741 = vmatmul.msk.f32.vlgmr.msra.gmra.mxu0 %vm316_vm1, %v256_v6  ;;  %750 = vmatmul.msk.f32.vlgmr.msra.gmra.mxu1 %vm316_vm1, %v256_v6 }
  0x28   : > { %p894_p7 = pnand %p893_p6, %p889_p2 }
  0x29   : > { %274 = vperm.xlu0 %867, %v264_v7   ;;  %279 = vperm.xlu1 %868, %v265_v8  }
  0x2b   : > { %470 = vperm.xlu2 %869, %v460_v22  }
  0x2f   : > { %742 = vmatmul.msk.f32.gmra.mxu0 %vm316_vm1, %v257_v11  ;;  %751 = vmatmul.msk.f32.gmra.mxu1 %vm316_vm1, %v257_v11 }
  0x31   : > { %475 = vperm.xlu0 %867, %v461_v12   ;;  %480 = vperm.xlu1 %868, %v462_v16  }
  0x33   : > { %485 = vperm.xlu2 %869, %v463_v24  }
  0x37   : > { %743 = vmatmul.msk.f32.gmra.mxu0 %vm316_vm1, %v258_v13  ;;  %752 = vmatmul.msk.f32.gmra.mxu1 %vm316_vm1, %v258_v13 }
  0x39   : > { %490 = vperm.xlu0 %867, %v464_v15   ;;  %495 = vperm.xlu1 %868, %v465_v20  }
  0x3b   : > { %500 = vperm.xlu2 %869, %v466_v26  }
  0x3f   : > { %744 = vmatmul.msk.f32.gmra.mxu0 %vm316_vm1, %v259_v17  ;;  %753 = vmatmul.msk.f32.gmra.mxu1 %vm316_vm1, %v259_v17 }
  0x41   : > { %505 = vperm.xlu0 %867, %v467_v19  }
  0x47   : > { %745 = vmatmul.msk.f32.gmra.mxu0 %vm316_vm1, %v260_v21  ;;  %754 = vmatmul.msk.f32.gmra.mxu1 %vm316_vm1, %v260_v21 }
  0x4f   : > { %746 = vmatmul.msk.f32.gmra.mxu0 %vm316_vm1, %v261_v23  ;;  %755 = vmatmul.msk.f32.gmra.mxu1 %vm316_vm1, %v261_v23 }
  0x57   : > { %747 = vmatmul.msk.f32.gmra.mxu0 %vm316_vm1, %v262_v25  ;;  %756 = vmatmul.msk.f32.gmra.mxu1 %vm316_vm1, %v262_v25 }
  0x5f   : > { %748 = vmatmul.msk.f32.gmra.mxu0 %vm316_vm1, %v263_v27  ;;  %757 = vmatmul.msk.f32.gmra.mxu1 %vm316_vm1, %v263_v27 }
  0x75   : > { %v285_v42 = vpop.permute.xlu2 %284 }
  0x7d   : > { %v290_v51 = vpop.permute.xlu2 %289 }
  0x8b   : > { %v295_v40 = vpop.permute.xlu1 %294  ;;  %v305_v41 = vpop.permute.xlu0 %304 }
  0x93   : > { %v300_v45 = vpop.permute.xlu1 %299  ;;  %v310_v46 = vpop.permute.xlu0 %309 }
  0x9b   : > { %v280_v0 = vpop.permute.xlu1 %279  ;;  %v275_v9 = vpop.permute.xlu0 %274 }
  0xa4   : > { %v363_v28 = vpop.f32.mrf.mxu0  ;;  %v404_v29 = vpop.f32.mrf.mxu1 }
  0xa5   : > { %v364_v16 = vadd.f32 %v363_v28, %v275_v9  ;;  %v405_v17 = vadd.f32 %v404_v29, %v275_v9  ;;  %v788_v28 = vld [vmem:[%s1251_s3] sm:$0xff]  ;;  %v789_v29 = vld [vmem:[%s1251_s3 + $0x8] sm:$0xff] }
  0xa7   : > { %v428_v24 = vmax.f32 %v364_v16, 0.0  ;;  %v429_v25 = vmax.f32 %v405_v17, 0.0 }
  0xac   : > { %v366_v30 = vpop.f32.mrf.mxu0  ;;  %v407_v31 = vpop.f32.mrf.mxu1 }
  0xad   : > { %v367_v10 = vadd.f32 %v366_v30, %v280_v0  ;;  %v408_v11 = vadd.f32 %v407_v31, %v280_v0  ;;  %v790_v30 = vld [vmem:[%s1251_s3 + $0x10] sm:$0xff]  ;;  %v791_v31 = vld [vmem:[%s1251_s3 + $0x18] sm:$0xff] }
  0xaf   : > { %v430_v20 = vmax.f32 %v367_v10, 0.0  ;;  %v431_v21 = vmax.f32 %v408_v11, 0.0 }
  0xb1   : > { %v452_v26 = vpack.c.bf16 %v430_v20, %v428_v24  ;;  %v453_v27 = vpack.c.bf16 %v431_v21, %v429_v25 }
  0xb4   : > { %v369_v32 = vpop.f32.mrf.mxu0  ;;  %v410_v33 = vpop.f32.mrf.mxu1 }
  0xb5   : > { %v370_v5 = vadd.f32 %v369_v32, %v285_v42  ;;  %v411_v6 = vadd.f32 %v410_v33, %v285_v42  ;;  %v471_v32 = vpop.permute.xlu2 %470 }
  0xb7   : > { %v432_v18 = vmax.f32 %v370_v5, 0.0  ;;  %v433_v19 = vmax.f32 %v411_v6, 0.0 }
  0xbc   : > { %v372_v34 = vpop.f32.mrf.mxu0  ;;  %v413_v35 = vpop.f32.mrf.mxu1 }
  0xbd   : > { %v373_v62 = vadd.f32 %v372_v34, %v290_v51  ;;  %v414_v63 = vadd.f32 %v413_v35, %v290_v51 }
  0xbf   : > { %v434_v12 = vmax.f32 %v373_v62, 0.0  ;;  %v435_v13 = vmax.f32 %v414_v63, 0.0 }
  0xc1   : > { %v454_v22 = vpack.c.bf16 %v434_v12, %v432_v18  ;;  %v455_v23 = vpack.c.bf16 %v435_v13, %v433_v19 }
  0xc4   : > { %v375_v36 = vpop.f32.mrf.mxu0  ;;  %v416_v37 = vpop.f32.mrf.mxu1 }
  0xc5   : > { %v376_v56 = vadd.f32 %v375_v36, %v295_v40  ;;  %v417_v57 = vadd.f32 %v416_v37, %v295_v40 }
  0xc7   : > { %v436_v7 = vmax.f32 %v376_v56, 0.0  ;;  %v437_v8 = vmax.f32 %v417_v57, 0.0 }
  0xcc   : > { %v378_v38 = vpop.f32.mrf.mxu0  ;;  %v419_v39 = vpop.f32.mrf.mxu1 }
  0xcd   : > { %v379_v52 = vadd.f32 %v378_v38, %v300_v45  ;;  %v420_v53 = vadd.f32 %v419_v39, %v300_v45  ;;  %v476_v39 = vpop.permute.xlu0 %475 }
  0xcf   : > { %v438_v1 = vmax.f32 %v379_v52, 0.0  ;;  %v439_v2 = vmax.f32 %v420_v53, 0.0  ;;  %v486_v53 = vpop.permute.xlu2 %485 }
  0xd1   : > { %v456_v14 = vpack.c.bf16 %v438_v1, %v436_v7  ;;  %v457_v15 = vpack.c.bf16 %v439_v2, %v437_v8 }
  0xd4   : > { %v381_v43 = vpop.f32.mrf.mxu0  ;;  %v422_v44 = vpop.f32.mrf.mxu1 }
  0xd5   : > { %v382_v47 = vadd.f32 %v381_v43, %v305_v41  ;;  %v423_v48 = vadd.f32 %v422_v44, %v305_v41 }
  0xd7   : > { %v440_v58 = vmax.f32 %v382_v47, 0.0  ;;  %v441_v59 = vmax.f32 %v423_v48, 0.0  ;;  %v501_v10 = vpop.permute.xlu2 %500 }
  0xdc   : > { %v384_v49 = vpop.f32.mrf.mxu0  ;;  %v425_v50 = vpop.f32.mrf.mxu1 }
  0xdd   : > { %v385_v54 = vadd.f32 %v384_v49, %v310_v46  ;;  %v426_v55 = vadd.f32 %v425_v50, %v310_v46  ;;  %v481_v46 = vpop.permute.xlu1 %480 }
  0xdf   : > { %v442_v60 = vmax.f32 %v385_v54, 0.0  ;;  %v443_v61 = vmax.f32 %v426_v55, 0.0 }
  0xe1   : > { %v458_v3 = vpack.c.bf16 %v442_v60, %v440_v58  ;;  %v459_v4 = vpack.c.bf16 %v443_v61, %v441_v59  ;;  %v491_v60 = vpop.permute.xlu0 %490 }
  0xe3   : > { %545 = vmatpush.bf16.msra.mxu2 %v458_v3  ;;  %574 = vmatpush.bf16.msra.mxu3 %v459_v4 }
  0xe5   : > { %v496_v3 = vpop.permute.xlu1 %495 }
  0xe7   : > { %546 = vmatpush.bf16.msra.mxu2 %v456_v14  ;;  %575 = vmatpush.bf16.msra.mxu3 %v457_v15 }
  0xe9   : > { %v506_v17 = vpop.permute.xlu0 %505 }
  0xeb   : > { %547 = vmatpush.bf16.msra.mxu2 %v454_v22  ;;  %576 = vmatpush.bf16.msra.mxu3 %v455_v23 }
  0xef   : > { %548 = vmatpush.bf16.msra.mxu2 %v452_v26  ;;  %577 = vmatpush.bf16.msra.mxu3 %v453_v27 }
  0xf2   : > { %774 = vmatmul.msk.bf16.vlgmr.msra.gmra.mxu2 %vm528_vm2, %v788_v28  ;;  %778 = vmatmul.msk.bf16.vlgmr.msra.gmra.mxu3 %vm528_vm2, %v788_v28 }
 0x102   : > { %775 = vmatmul.msk.bf16.gmra.mxu2 %vm528_vm2, %v789_v29  ;;  %779 = vmatmul.msk.bf16.gmra.mxu3 %vm528_vm2, %v789_v29 }
 0x112   : > { %776 = vmatmul.msk.bf16.gmra.mxu2 %vm528_vm2, %v790_v30  ;;  %780 = vmatmul.msk.bf16.gmra.mxu3 %vm528_vm2, %v790_v30 }
 0x122   : > { %777 = vmatmul.msk.bf16.gmra.mxu2 %vm528_vm2, %v791_v31  ;;  %781 = vmatmul.msk.bf16.gmra.mxu3 %vm528_vm2, %v791_v31 }
 0x175   : > { %v550_v33 = vpop.f32.mrf.mxu2  ;;  %v579_v34 = vpop.f32.mrf.mxu3 }
 0x176   : > { %v551_v35 = vadd.f32 %v550_v33, %v471_v32  ;;  %v580_v36 = vadd.f32 %v579_v34, %v471_v32 }
 0x178   : > { %v599_v37 = vmax.f32 %v551_v35, 0.0  ;;  %v600_v38 = vmax.f32 %v580_v36, 0.0 }
 0x17a   : > { %615 = vst [vmem:[%s1184_s21] sm:$0xff] %v599_v37 }
 0x17b   : > { %616 = vst [vmem:[%s1184_s21 + $0x8] sm:$0xff] %v600_v38 }
 0x17d   : > { %v552_v40 = vpop.f32.mrf.mxu2  ;;  %v581_v41 = vpop.f32.mrf.mxu3 }
 0x17e   : > { %v553_v42 = vadd.f32 %v552_v40, %v476_v39  ;;  %v582_v43 = vadd.f32 %v581_v41, %v476_v39 }
 0x180   : > { %v601_v44 = vmax.f32 %v553_v42, 0.0  ;;  %v602_v45 = vmax.f32 %v582_v43, 0.0 }
 0x182   : > { %617 = vst [vmem:[%s1184_s21 + $0x10] sm:$0xff] %v601_v44 }
 0x183   : > { %618 = vst [vmem:[%s1184_s21 + $0x18] sm:$0xff] %v602_v45 }
 0x185   : > { %v555_v47 = vpop.f32.mrf.mxu2  ;;  %v584_v48 = vpop.f32.mrf.mxu3 }
 0x186   : > { %v556_v49 = vadd.f32 %v555_v47, %v481_v46  ;;  %v585_v50 = vadd.f32 %v584_v48, %v481_v46 }
 0x188   : > { %v603_v51 = vmax.f32 %v556_v49, 0.0  ;;  %v604_v52 = vmax.f32 %v585_v50, 0.0 }
 0x18a   : > { %619 = vst [vmem:[%s1184_s21 + $0x20] sm:$0xff] %v603_v51 }
 0x18b   : > { %620 = vst [vmem:[%s1184_s21 + $0x28] sm:$0xff] %v604_v52 }
 0x18d   : > { %v557_v54 = vpop.f32.mrf.mxu2  ;;  %v586_v55 = vpop.f32.mrf.mxu3 }
 0x18e   : > { %v558_v56 = vadd.f32 %v557_v54, %v486_v53  ;;  %v587_v57 = vadd.f32 %v586_v55, %v486_v53 }
 0x190   : > { %v605_v58 = vmax.f32 %v558_v56, 0.0  ;;  %v606_v59 = vmax.f32 %v587_v57, 0.0 }
 0x192   : > { %621 = vst [vmem:[%s1184_s21 + $0x30] sm:$0xff] %v605_v58 }
 0x193   : > { %622 = vst [vmem:[%s1184_s21 + $0x38] sm:$0xff] %v606_v59 }
 0x195   : > { %v560_v61 = vpop.f32.mrf.mxu2  ;;  %v589_v62 = vpop.f32.mrf.mxu3 }
 0x196   : > { %v561_v63 = vadd.f32 %v560_v61, %v491_v60  ;;  %v590_v0 = vadd.f32 %v589_v62, %v491_v60 }
 0x198   : > { %v607_v1 = vmax.f32 %v561_v63, 0.0  ;;  %v608_v2 = vmax.f32 %v590_v0, 0.0 }
 0x19a   : > { %623 = vst [vmem:[%s1184_s21 + $0x40] sm:$0xff] %v607_v1 }
 0x19b   : > { %624 = vst [vmem:[%s1184_s21 + $0x48] sm:$0xff] %v608_v2 }
 0x19d   : > { %v562_v4 = vpop.f32.mrf.mxu2  ;;  %v591_v5 = vpop.f32.mrf.mxu3 }
 0x19e   : > { %v563_v6 = vadd.f32 %v562_v4, %v496_v3  ;;  %v592_v7 = vadd.f32 %v591_v5, %v496_v3 }
 0x1a0   : > { %v609_v8 = vmax.f32 %v563_v6, 0.0  ;;  %v610_v9 = vmax.f32 %v592_v7, 0.0 }
 0x1a2   : > { %625 = vst [vmem:[%s1184_s21 + $0x50] sm:$0xff] %v609_v8 }
 0x1a3   : > { %626 = vst [vmem:[%s1184_s21 + $0x58] sm:$0xff] %v610_v9 }
 0x1a5   : > { %v565_v11 = vpop.f32.mrf.mxu2  ;;  %v594_v12 = vpop.f32.mrf.mxu3 }
 0x1a6   : > { %v566_v13 = vadd.f32 %v565_v11, %v501_v10  ;;  %v595_v14 = vadd.f32 %v594_v12, %v501_v10 }
 0x1a8   : > { %v611_v15 = vmax.f32 %v566_v13, 0.0  ;;  %v612_v16 = vmax.f32 %v595_v14, 0.0 }
 0x1aa   : > { %627 = vst [vmem:[%s1184_s21 + $0x60] sm:$0xff] %v611_v15 }
 0x1ab   : > { %628 = vst [vmem:[%s1184_s21 + $0x68] sm:$0xff] %v612_v16 }
 0x1ad   : > { %v567_v18 = vpop.f32.mrf.mxu2  ;;  %v596_v19 = vpop.f32.mrf.mxu3 }
 0x1ae   : > { %v568_v20 = vadd.f32 %v567_v18, %v506_v17  ;;  %v597_v21 = vadd.f32 %v596_v19, %v506_v17 }
 0x1b0   : > { %v613_v22 = vmax.f32 %v568_v20, 0.0  ;;  %v614_v23 = vmax.f32 %v597_v21, 0.0 }
 0x1b2   : > { %629 = vst [vmem:[%s1184_s21 + $0x70] sm:$0xff] %v613_v22 }
 0x1b3   : > { %630 = vst [vmem:[%s1184_s21 + $0x78] sm:$0xff] %v614_v23 }
 0x1b4   : > { %897 = shalt.err (!%p894_p7)
}
 0x1b5   : > { %s967_s28 = smov 256   ;;  %s968_s21 = smov 1024  }
 0x1b6   : > { %s969_s10 = smov 16  }
 0x1b7   : > { %792 = dma.vmem_to_hbm [thread:$0]  (%p1051_p3), %s647_s15, 2048, %s649_s14, %s632_s16, %s967_s28, %s968_s21, %s969_s10  }
 0x1b8 PF: > { %p798_p9 = scmp.ge.s32.totalorder %s964_s25, 2  ;;  %s663_s12 = sand.u32 1, %s936_s18  }
 0x1b9   : > { %s664_s13 = scalar_lea.sflag [#allocation3], %s663_s12 }
 0x1ba   : > { %p795_p10 = pnand %p798_p9, %p1060_p8 }
 0x1bc   : > { %p796_p11 = pneg %p795_p10 }
 0x1be   : > { %931 = dma.done.wait (%p796_p11), %s664_s13, 2048  }
 0x1bf   : > { %933 = vsyncadd (%p796_p11), %s664_s13, 4294965248  ;;  %s18_s25 = sadd.s32 1, %s964_s25   ;;  %s1260_s6 = sld [smem:[#allocation5_spill]] }
 0x1c0   : > { %p15_p12 = scmp.ge.s32.totalorder %s18_s25, 10   ;;  %s1261_s14 = sld [smem:[#allocation6_spill]] }
 0x1c1   : > { %s1262_s18 = smov %s940_s19  ;;  %s1263_s19 = smov %s944_s20 }
 0x1c2   : > { %s1264_s20 = smov %s1069_s11  ;;  %s1265_s21 = smov %s956_s23 }
 0x1c3   : > { %s1266_s22 = smov %s960_s24  ;;  %17 = sbr.rel (!%p15_p12) target bundleno = 5 (0x5), region = 75 }
 0x1c5   : > { %s1267_s23 = smov %s1260_s6 }
 0x1c6   : > { %s1268_s24 = smov %s1261_s14 }
 0x1c8   :  { %670 = vsyncpa [#allocation3], 1 }
 0x1c9   :  { %672 = vsyncpa [#allocation3 + $0x1], 1 }

</bundles_post_ra>
